<compile_context>
chip_gen: v7x
topology: tpu7x:2x2x1
jax: 0.10.0
libtpu: 0.0.40
codegen_flags: <defaults>
</compile_context>

<pallas_src>
from functools import partial

import jax
import jax.numpy as jnp
from jax.experimental import pallas as pl
from jax.experimental.pallas import tpu as pltpu


def _silu(v):
    return v * jax.nn.sigmoid(v)


# ----------------------------------------------------------------------------
# Router kernel: logits -> softmax -> top-k -> dense combine weights (tM, E)
# ----------------------------------------------------------------------------
def _router_kernel(x_ref, wr_ref, comb_ref, *, n_experts, top_k, norm_topk):
    x = x_ref[...]                                                      # (tM, H) f32
    logits = jnp.dot(x, wr_ref[...], preferred_element_type=jnp.float32)
    mx = jnp.max(logits, axis=-1, keepdims=True)
    ex = jnp.exp(logits - mx)
    scores = ex / jnp.sum(ex, axis=-1, keepdims=True)                   # (tM, E)

    # top-k with first-occurrence tie break (matches torch.topk)
    iota = jax.lax.broadcasted_iota(jnp.int32, scores.shape, 1)
    masked = scores
    combine = jnp.zeros_like(scores)
    for _ in range(top_k):
        cur = jnp.max(masked, axis=-1, keepdims=True)
        first = jnp.min(jnp.where(masked == cur, iota, n_experts),
                        axis=-1, keepdims=True)
        sel = iota == first
        combine = jnp.where(sel, scores, combine)
        masked = jnp.where(sel, -jnp.inf, masked)
    if top_k > 1 and norm_topk:
        combine = combine / (jnp.sum(combine, axis=-1, keepdims=True) + 1e-20)
    comb_ref[...] = combine


# ----------------------------------------------------------------------------
# Expert kernel: grid = (token_tiles, E_total). Fused gate|up matmul + SwiGLU
# + down-proj for one expert per step; f32 VMEM accumulator; single store at
# the last expert step. Shared experts are trailing steps with weight 1.0.
# ----------------------------------------------------------------------------
def _expert_kernel(act_ref, comb_ref, x_ref, wgu_ref, wd_ref, o_ref, acc_ref,
                   *, inter):
    t = pl.program_id(0)
    e = pl.program_id(1)

    @pl.when(e == 0)
    def _():
        acc_ref[...] = jnp.zeros_like(acc_ref)

    # Skip experts that no token in this tile routed to (shared experts always on).
    @pl.when(act_ref[t, e] > 0)
    def _():
        # select column e of the per-tile combine weights -> (tM, 1) f32
        col = jax.lax.broadcasted_iota(jnp.int32, comb_ref.shape, 1)
        w = jnp.sum(jnp.where(col == e, comb_ref[...], 0.0),
                    axis=-1, keepdims=True)

        gu = jnp.dot(x_ref[...], wgu_ref[...],
                     preferred_element_type=jnp.float32)                # (tM, 2I) f32
        g = gu[:, :inter]
        u = gu[:, inter:]
        h = _silu(g) * u                                                # f32
        out_e = jnp.dot(h.astype(wd_ref.dtype), wd_ref[...],
                        preferred_element_type=jnp.float32)             # (tM, H) f32
        acc_ref[...] += w * out_e

    @pl.when(e == pl.num_programs(1) - 1)
    def _():
        o_ref[...] = acc_ref[...].astype(o_ref.dtype)


# ----------------------------------------------------------------------------
# Wrapper
# ----------------------------------------------------------------------------
def moe_feedforward(x, params, *, top_k, norm_topk_prob=True):
    """x: (B, S, H). params: (wr, wg, wu, wd, sg, su, sd) in f32."""
    B, S, H = x.shape
    T = B * S
    xf = x.reshape(T, H).astype(jnp.float32)
    wr, wg, wu, wd, sg, su, sd = params
    E, _, I = wg.shape
    Sh = sg.shape[0]
    E_tot = E + Sh

    # Token tile size: 256 matches v6e/v7x MXU, 128 matches v5e; tiny inputs
    # fall back to the full token count.
    if T % 256 == 0:
        tM = 256
    elif T % 128 == 0:
        tM = 128
    else:
        tM = T
    nT = T // tM

    # ---------------- router (small pallas_call), f32 throughout -------------
    combine_routed = pl.pallas_call(
        partial(_router_kernel, n_experts=E, top_k=top_k,
                norm_topk=norm_topk_prob),
        out_shape=jax.ShapeDtypeStruct((T, E), jnp.float32),
        grid=(nT,),
        in_specs=[
            pl.BlockSpec((tM, H), lambda t: (t, 0)),
            pl.BlockSpec((H, E), lambda t: (0, 0)),
        ],
        out_specs=pl.BlockSpec((tM, E), lambda t: (t, 0)),
        compiler_params=pltpu.CompilerParams(
            dimension_semantics=("parallel",)),
    )(xf, wr.astype(jnp.float32))

    # Shared experts get a fixed combine weight of 1.0 (trailing columns).
    if Sh > 0:
        combine = jnp.concatenate(
            [combine_routed, jnp.ones((T, Sh), jnp.float32)], axis=-1)
    else:
        combine = combine_routed

    # Per-(tile, expert) activity flags -> SMEM scalar prefetch.
    active = (combine.reshape(nT, tM, E_tot) > 0.0).any(axis=1).astype(jnp.int32)

    # Fuse gate+up into one (E_tot, H, 2I) tensor; append shared experts; bf16.
    wgu = jnp.concatenate([wg, wu], axis=-1)                 # (E, H, 2I)
    wd_all = wd
    if Sh > 0:
        sgu = jnp.concatenate([sg, su], axis=-1)             # (Sh, H, 2I)
        wgu = jnp.concatenate([wgu, sgu], axis=0)            # (E_tot, H, 2I)
        wd_all = jnp.concatenate([wd, sd], axis=0)           # (E_tot, I, H)
    wgu = wgu.astype(jnp.bfloat16)
    wd_all = wd_all.astype(jnp.bfloat16)
    x_bf = xf.astype(jnp.bfloat16)

    # TODO(synk): for very large E/top_k ratios, a grouped-matmul (sort tokens by
    # expert + PrefetchScalarGridSpec offsets) would remove the per-tile dense
    # scan entirely; the pl.when skip below is the lighter-weight variant.
    out = pl.pallas_call(
        partial(_expert_kernel, inter=I),
        out_shape=jax.ShapeDtypeStruct((T, H), x.dtype),
        grid_spec=pltpu.PrefetchScalarGridSpec(
            num_scalar_prefetch=1,
            grid=(nT, E_tot),
            in_specs=[
                pl.BlockSpec((tM, E_tot), lambda t, e, act: (t, 0)),
                pl.BlockSpec((tM, H), lambda t, e, act: (t, 0)),
                pl.BlockSpec((pl.Squeezed(), H, 2 * I),
                             lambda t, e, act: (e, 0, 0)),
                pl.BlockSpec((pl.Squeezed(), I, H),
                             lambda t, e, act: (e, 0, 0)),
            ],
            out_specs=pl.BlockSpec((tM, H), lambda t, e, act: (t, 0)),
            scratch_shapes=[pltpu.VMEM((tM, H), jnp.float32)],
        ),
        compiler_params=pltpu.CompilerParams(
            dimension_semantics=("parallel", "arbitrary"),
            vmem_limit_bytes=48 * 1024 * 1024),   # safe on v5e/v6e (128 MiB) and v7x (64 MiB)
    )(active, combine, x_bf, wgu, wd_all)

    return out.reshape(B, S, H)


# ----------------------------------------------------------------------------
# Pure-JAX reference (f32) mirroring MOEFeedForward.forward eval path
# ----------------------------------------------------------------------------
def reference(x, params, *, top_k, norm_topk_prob=True):
    B, S, H = x.shape
    xf = x.reshape(-1, H)
    wr, wg, wu, wd, sg, su, sd = params
    E = wg.shape[0]
    logits = xf @ wr
    scores = jax.nn.softmax(logits, axis=-1)
    topv, topi = jax.lax.top_k(scores, top_k)
    if top_k > 1 and norm_topk_prob:
        topv = topv / (topv.sum(-1, keepdims=True) + 1e-20)
    comb = jnp.zeros_like(scores)
    comb = comb.at[jnp.arange(xf.shape[0])[:, None], topi].add(topv)
    y = jnp.zeros_like(xf)
    for e in range(E):
        h = _silu(xf @ wg[e]) * (xf @ wu[e])
        y = y + comb[:, e:e + 1] * (h @ wd[e])
    for s in range(sg.shape[0]):
        h = _silu(xf @ sg[s]) * (xf @ su[s])
        y = y + h @ sd[s]
    return y.reshape(B, S, H)


def init_params(key, hidden, intermediate, n_experts, n_shared):
    ks = jax.random.split(key, 7)
    scale_h = 1.0 / jnp.sqrt(hidden)
    scale_i = 1.0 / jnp.sqrt(intermediate)
    wr = jax.random.uniform(ks[0], (hidden, n_experts), jnp.float32, -scale_h, scale_h)
    wg = jax.random.uniform(ks[1], (n_experts, hidden, intermediate), jnp.float32, -scale_h, scale_h)
    wu = jax.random.uniform(ks[2], (n_experts, hidden, intermediate), jnp.float32, -scale_h, scale_h)
    wd = jax.random.uniform(ks[3], (n_experts, intermediate, hidden), jnp.float32, -scale_i, scale_i)
    sg = jax.random.uniform(ks[4], (n_shared, hidden, intermediate), jnp.float32, -scale_h, scale_h)
    su = jax.random.uniform(ks[5], (n_shared, hidden, intermediate), jnp.float32, -scale_h, scale_h)
    sd = jax.random.uniform(ks[6], (n_shared, intermediate, hidden), jnp.float32, -scale_i, scale_i)
    return wr, wg, wu, wd, sg, su, sd


if __name__ == "__main__":
    # Small config consistent with DeciMindConfig defaults (scaled down):
    # hidden_size=32 -> intermediate = 64*ceil(int(32*8/3)/64) = 128
    batch, seq, hidden = 2, 8, 32
    intermediate = 64 * ((int(hidden * 8 / 3) + 63) // 64)   # 128
    n_routed_experts, num_experts_per_tok, n_shared_experts = 4, 2, 1

    key = jax.random.PRNGKey(0)
    kx, kp = jax.random.split(key)
    x = jax.random.normal(kx, (batch, seq, hidden), jnp.float32)
    params = init_params(kp, hidden, intermediate, n_routed_experts, n_shared_experts)

    y = moe_feedforward(x, params, top_k=num_experts_per_tok, norm_topk_prob=True)
    y = jax.block_until_ready(y)

    y_ref = reference(x, params, top_k=num_experts_per_tok, norm_topk_prob=True)
    assert y.shape == (batch, seq, hidden)
    # Expert matmuls run in bf16 (f32 accumulation); router/top-k are exact f32.
    assert jnp.allclose(y, y_ref, rtol=3e-2, atol=3e-2), "mismatch vs reference"

    print("KERNEL_OK")
</pallas_src>

<mosaic_0001>
module attributes {stable_mosaic.version = 11 : i64} {
  func.func @_router_kernel(%arg0: i32, %arg1: memref<16x32xf32, #tpu.memory_space<vmem>>, %arg2: memref<32x4xf32, #tpu.memory_space<vmem>>, %arg3: memref<16x4xf32, #tpu.memory_space<vmem>>) attributes {dimension_semantics = [#tpu.dimension_semantics<parallel>], iteration_bounds = array<i64: 1>, scalar_prefetch = 0 : i64, scratch_operands = 0 : i64, tpu.core_type = #tpu.core_type<tc>, window_params = [{transform_indices = @transform_0, window_bounds = array<i64: 16, 32>}, {pipeline_mode = #tpu.pipeline_mode<synchronous>, transform_indices = @transform_1, window_bounds = array<i64: 32, 4>}, {transform_indices = @transform_2, window_bounds = array<i64: 16, 4>}]} {
    %c0 = arith.constant 0 : index
    %c0_0 = arith.constant 0 : index
    %0 = vector.load %arg1[%c0, %c0_0] : memref<16x32xf32, #tpu.memory_space<vmem>>, vector<16x32xf32>
    %c0_1 = arith.constant 0 : index
    %c0_2 = arith.constant 0 : index
    %1 = vector.load %arg2[%c0_1, %c0_2] : memref<32x4xf32, #tpu.memory_space<vmem>>, vector<32x4xf32>
    %cst = arith.constant dense<0.000000e+00> : vector<16x4xf32>
    %2 = tpu.matmul %0, %1, %cst {dimension_numbers = #tpu.dot_dimension_numbers<[1], [0], [0], [1], [0, 0, 1, 1], [], []>} : vector<16x32xf32>, vector<32x4xf32>, vector<16x4xf32> -> vector<16x4xf32>
    %cst_3 = arith.constant dense<0xFF800000> : vector<16xf32>
    %3 = vector.multi_reduction <maximumf>, %2, %cst_3 [1] : vector<16x4xf32> to vector<16xf32>
    %4 = vector.shape_cast %3 : vector<16xf32> to vector<16x1xf32>
    %5 = vector.broadcast %4 : vector<16x1xf32> to vector<16x4xf32>
    %6 = arith.subf %2, %5 : vector<16x4xf32>
    %7 = math.exp %6 : vector<16x4xf32>
    %cst_4 = arith.constant dense<0.000000e+00> : vector<16xf32>
    %8 = vector.multi_reduction <add>, %7, %cst_4 [1] : vector<16x4xf32> to vector<16xf32>
    %9 = vector.shape_cast %8 : vector<16xf32> to vector<16x1xf32>
    %10 = vector.broadcast %9 : vector<16x1xf32> to vector<16x4xf32>
    %11 = arith.divf %7, %10 : vector<16x4xf32>
    %12 = tpu.iota {dimensions = array<i32: 1>} : vector<16x4xi32>
    %cst_5 = arith.constant 0.000000e+00 : f32
    %13 = vector.broadcast %cst_5 : f32 to vector<16x4xf32>
    %cst_6 = arith.constant dense<0xFF800000> : vector<16xf32>
    %14 = vector.multi_reduction <maximumf>, %11, %cst_6 [1] : vector<16x4xf32> to vector<16xf32>
    %15 = vector.shape_cast %14 : vector<16xf32> to vector<16x1xf32>
    %16 = vector.broadcast %15 : vector<16x1xf32> to vector<16x4xf32>
    %17 = arith.cmpf oeq, %11, %16 : vector<16x4xf32>
    %c4_i32 = arith.constant 4 : i32
    %18 = vector.broadcast %c4_i32 : i32 to vector<16x4xi32>
    %19 = arith.select %17, %12, %18 : vector<16x4xi1>, vector<16x4xi32>
    %cst_7 = arith.constant dense<2147483647> : vector<16xi32>
    %20 = vector.multi_reduction <minsi>, %19, %cst_7 [1] : vector<16x4xi32> to vector<16xi32>
    %21 = vector.shape_cast %20 : vector<16xi32> to vector<16x1xi32>
    %22 = vector.broadcast %21 : vector<16x1xi32> to vector<16x4xi32>
    %23 = arith.cmpi eq, %12, %22 : vector<16x4xi32>
    %24 = arith.select %23, %11, %13 : vector<16x4xi1>, vector<16x4xf32>
    %cst_8 = arith.constant 0xFF800000 : f32
    %25 = vector.broadcast %cst_8 : f32 to vector<16x4xf32>
    %26 = arith.select %23, %25, %11 : vector<16x4xi1>, vector<16x4xf32>
    %cst_9 = arith.constant dense<0xFF800000> : vector<16xf32>
    %27 = vector.multi_reduction <maximumf>, %26, %cst_9 [1] : vector<16x4xf32> to vector<16xf32>
    %28 = vector.shape_cast %27 : vector<16xf32> to vector<16x1xf32>
    %29 = vector.broadcast %28 : vector<16x1xf32> to vector<16x4xf32>
    %30 = arith.cmpf oeq, %26, %29 : vector<16x4xf32>
    %c4_i32_10 = arith.constant 4 : i32
    %31 = vector.broadcast %c4_i32_10 : i32 to vector<16x4xi32>
    %32 = arith.select %30, %12, %31 : vector<16x4xi1>, vector<16x4xi32>
    %cst_11 = arith.constant dense<2147483647> : vector<16xi32>
    %33 = vector.multi_reduction <minsi>, %32, %cst_11 [1] : vector<16x4xi32> to vector<16xi32>
    %34 = vector.shape_cast %33 : vector<16xi32> to vector<16x1xi32>
    %35 = vector.broadcast %34 : vector<16x1xi32> to vector<16x4xi32>
    %36 = arith.cmpi eq, %12, %35 : vector<16x4xi32>
    %37 = arith.select %36, %11, %24 : vector<16x4xi1>, vector<16x4xf32>
    %cst_12 = arith.constant dense<0.000000e+00> : vector<16xf32>
    %38 = vector.multi_reduction <add>, %37, %cst_12 [1] : vector<16x4xf32> to vector<16xf32>
    %39 = vector.shape_cast %38 : vector<16xf32> to vector<16x1xf32>
    %cst_13 = arith.constant 9.99999968E-21 : f32
    %40 = vector.broadcast %cst_13 : f32 to vector<16x1xf32>
    %41 = arith.addf %39, %40 : vector<16x1xf32>
    %42 = vector.broadcast %41 : vector<16x1xf32> to vector<16x4xf32>
    %43 = arith.divf %37, %42 : vector<16x4xf32>
    %c0_14 = arith.constant 0 : index
    %c0_15 = arith.constant 0 : index
    %44 = vector.load %arg3[%c0_14, %c0_15] : memref<16x4xf32, #tpu.memory_space<vmem>>, vector<16x4xf32>
    tpu.vector_store %arg3[%c0_14, %c0_15], %43 {strides = array<i32>} : memref<16x4xf32, #tpu.memory_space<vmem>>, vector<16x4xf32>,
    return
  }
  func.func @transform_0(%arg0: i32) -> (i32, i32) {
    %c0_i32 = arith.constant 0 : i32
    %c0_i32_0 = arith.constant 0 : i32
    return %arg0, %c0_i32 : i32, i32
  }
  func.func @transform_1(%arg0: i32) -> (i32, i32) {
    %c0_i32 = arith.constant 0 : i32
    %c0_i32_0 = arith.constant 0 : i32
    %c0_i32_1 = arith.constant 0 : i32
    return %c0_i32, %c0_i32_0 : i32, i32
  }
  func.func @transform_2(%arg0: i32) -> (i32, i32) {
    %c0_i32 = arith.constant 0 : i32
    %c0_i32_0 = arith.constant 0 : i32
    return %arg0, %c0_i32 : i32, i32
  }
}

</mosaic_0001>

<bundles_post_ra>
// kernel: tpu_custom_call.1
= control target key start
LH: loop header
LB: loop body
LE: loop exit
PB: predicated region body
PF: predicated region fallthrough
CT: control target
= control target key end

     0   :  { %vm17_vm0 = vcmask 261120   ;;  %vm99_vm1 = vcmask 31744   ;;  %v122_v30 = vlaneseq  ;;  %s358_s1 = inlined_call_operand.vmem [shape: f32[32,4], index: 1, kind: input, shape index: {}]   ;;  %s359_s0 = inlined_call_operand.vmem [shape: f32[16,32], index: 0, kind: input, shape index: {}]   ;;  %s360_s2 = inlined_call_operand.vmem [shape: f32[16,4], index: 2, kind: output, shape index: {}]  }
   0x1   :  { %v13_v0 = vld [vmem:[%s358_s1] sm:$0xff]  ;;  %v14_v1 = vld [vmem:[%s358_s1 + $0x8] sm:$0xff]  ;;  %v15_v2 = vld [vmem:[%s358_s1 + $0x10] sm:$0xff] }
   0x2   :  { %v251_v3 = vpack.c.bf16 %v14_v1, %v13_v0  ;;  %v16_v4 = vld [vmem:[%s358_s1 + $0x18] sm:$0xff]  ;;  %v11_v5 = vld [vmem:[%s359_s0] sm:$0xff]  ;;  %v12_v7 = vld [vmem:[%s359_s0 + $0x8] sm:$0xff]  ;;  %v316_v31 = vand.u32 127, %v122_v30 }
   0x3   :  { %v255_v6 = vpack.c.bf16 %v16_v4, %v15_v2  ;;  %248 = vmatprep.mubr.msk.f32.mxu0 %vm17_vm0, %v11_v5 }
   0x4   :  { %252 = vmatprep.subr.bf16.mxu0 %v251_v3 }
   0x5   :  { %254 = vmatpush3.bf16.msra.mxu0 %v251_v3 }
   0x6   :  { %256 = vmatprep.subr.bf16.mxu0 %v255_v6 }
   0x9   :  { %258 = vmatpush3.bf16.msra.mxu0 %v255_v6 }
   0xc   :  { %249 = vmatmul.mubr.msk.f32.vlgmr.msra.gmra.mrb[0].mxu0 %vm17_vm0, %v12_v7 }
  0xdf   :  { %v250_v8 = vpop.f32.mrb[0].mxu0 }
  0xe0   :  { %v90_v9 = vpop.f32.mrb[1].mxu0  ;;  %v103_v11 = vsel %vm99_vm1, %v250_v8, -inf }
  0xe1   :  { %v100_v10 = vsel %vm99_vm1, %v90_v9, -inf }
  0xe2   :  { %101 = vmax.xlane.f32.xlu0 %v100_v10 }
  0xe6   :  { %104 = vmax.xlane.f32.xlu0 %v103_v11 }
 0x16f   :  { %v102_v12 = vpop.xlane.xlu0 %101 }
 0x170   :  { %v106_v13 = vsub.f32 %v90_v9, %v102_v12 }
 0x172   :  { %v108_v14 = vmul.f32 1.442695, %v106_v13 }
 0x173   :  { %v105_v15 = vpop.xlane.xlu0 %104 }
 0x174   :  { %259 = vpow2.f32 %v108_v14  ;;  %v107_v16 = vsub.f32 %v250_v8, %v105_v15 }
 0x176   :  { %v110_v17 = vmul.f32 1.442695, %v107_v16 }
 0x178   :  { %261 = vpow2.f32 %v110_v17 }
 0x17e   :  { %v260_v18 = vpop.eup %259 }
 0x17f   :  { %v112_v19 = vsel %vm99_vm1, %v260_v18, 0.0 }
 0x180   :  { %113 = vadd.xlane.f32.xlu1 %v112_v19 }
 0x182   :  { %v262_v20 = vpop.eup %261 }
 0x183   :  { %v115_v21 = vsel %vm99_vm1, %v262_v20, 0.0 }
 0x184   :  { %116 = vadd.xlane.f32.xlu1 %v115_v21 }
 0x20d   :  { %v114_v22 = vpop.xlane.xlu1 %113 }
 0x20e   :  { %263 = vrcp.f32 %v114_v22 }
 0x211   :  { %v117_v23 = vpop.xlane.xlu1 %116 }
 0x212   :  { %265 = vrcp.f32 %v117_v23 }
 0x218   :  { %v264_v24 = vpop.eup %263 }
 0x219   :  { %v308_v25 = vmul.f32 %v264_v24, %v260_v18 }
 0x21b   :  { %v124_v26 = vsel %vm99_vm1, %v308_v25, -inf }
 0x21c   :  { %v266_v27 = vpop.eup %265  ;;  %125 = vmax.xlane.f32.xlu0 %v124_v26 }
 0x21d   :  { %v312_v28 = vmul.f32 %v266_v27, %v262_v20 }
 0x21f   :  { %v127_v29 = vsel %vm99_vm1, %v312_v28, -inf }
 0x220   :  { %128 = vmax.xlane.f32.xlu1 %v127_v29 }
 0x2a9   :  { %v126_v32 = vpop.xlane.xlu0 %125 }
 0x2aa   :  { %vm130_vm2 = vcmp.eq.f32.partialorder %v308_v25, %v126_v32 }
 0x2ab   :  { %v132_v33 = vsel %vm130_vm2, %v316_v31, 4 }
 0x2ac   :  { %v134_v34 = vsel %vm99_vm1, %v132_v33, 2147483647 }
 0x2ad   :  { %v129_v35 = vpop.xlane.xlu1 %128  ;;  %v136_v36 = vshra.s32 %v134_v34, 16  ;;  %v135_v42 = vand.u32 65535, %v134_v34 }
 0x2ae   :  { %vm131_vm3 = vcmp.eq.f32.partialorder %v312_v28, %v129_v35 }
 0x2af   :  { %v133_v37 = vsel %vm131_vm3, %v316_v31, 4  ;;  %v138_v38 = vcvt.s32.f32 %v136_v36  ;;  %v137_v44 = vcvt.s32.f32 %v135_v42 }
 0x2b0   :  { %v149_v39 = vsel %vm99_vm1, %v133_v37, 2147483647 }
 0x2b1   :  { %139 = vmin.xlane.f32.xlu0 %v138_v38  ;;  %v151_v40 = vshra.s32 %v149_v39, 16  ;;  %v150_v45 = vand.u32 65535, %v149_v39 }
 0x2b3   :  { %v153_v41 = vcvt.s32.f32 %v151_v40  ;;  %v152_v48 = vcvt.s32.f32 %v150_v45 }
 0x2b5   :  { %154 = vmin.xlane.f32.xlu1 %v153_v41 }
 0x33e   :  { %v140_v43 = vpop.xlane.xlu0 %139 }
 0x33f   :  { %vm141_vm4 = vcmp.eq.f32.partialorder %v138_v38, %v140_v43  ;;  %v146_v50 = vcvt.f32.s32 %v140_v43 }
 0x340   :  { %v142_v46 = vsel %vm141_vm4, %v137_v44, inf }
 0x341   :  { %143 = vmin.xlane.f32.xlu0 %v142_v46  ;;  %v147_v52 = vshll.u32 %v146_v50, 16 }
 0x342   :  { %v155_v47 = vpop.xlane.xlu1 %154 }
 0x343   :  { %vm156_vm5 = vcmp.eq.f32.partialorder %v153_v41, %v155_v47  ;;  %v161_v53 = vcvt.f32.s32 %v155_v47 }
 0x344   :  { %v157_v49 = vsel %vm156_vm5, %v152_v48, inf }
 0x345   :  { %158 = vmin.xlane.f32.xlu1 %v157_v49  ;;  %v162_v57 = vshll.u32 %v161_v53, 16 }
 0x3ce   :  { %v144_v51 = vpop.xlane.xlu0 %143 }
 0x3cf   :  { %v145_v54 = vcvt.f32.s32 %v144_v51 }
 0x3d1   :  { %v148_v55 = vadd.s32 %v147_v52, %v145_v54 }
 0x3d2   :  { %v159_v56 = vpop.xlane.xlu1 %158 }
 0x3d3   :  { %v160_v58 = vcvt.f32.s32 %v159_v56  ;;  %vm164_vm6 = vcmp.eq.s32.totalorder %v316_v31, %v148_v55 }
 0x3d4   :  { %v168_v59 = vsel %vm164_vm6, -inf, %v308_v25  ;;  %v166_v26 = vsel %vm164_vm6, %v308_v25, 0.0 }
 0x3d5   :  { %v163_v60 = vadd.s32 %v162_v57, %v160_v58  ;;  %v170_v61 = vsel %vm99_vm1, %v168_v59, -inf }
 0x3d6   :  { %171 = vmax.xlane.f32.xlu0 %v170_v61 }
 0x3d7   :  { %vm165_vm7 = vcmp.eq.s32.totalorder %v316_v31, %v163_v60 }
 0x3d8   :  { %v169_v62 = vsel %vm165_vm7, -inf, %v312_v28  ;;  %v167_v34 = vsel %vm165_vm7, %v312_v28, 0.0 }
 0x3d9   :  { %v173_v63 = vsel %vm99_vm1, %v169_v62, -inf }
 0x3da   :  { %174 = vmax.xlane.f32.xlu1 %v173_v63 }
 0x463   :  { %v172_v0 = vpop.xlane.xlu0 %171 }
 0x464   :  { %vm176_vm8 = vcmp.eq.f32.partialorder %v168_v59, %v172_v0 }
 0x465   :  { %v178_v1 = vsel %vm176_vm8, %v316_v31, 4 }
 0x466   :  { %v180_v2 = vsel %vm99_vm1, %v178_v1, 2147483647 }
 0x467   :  { %v175_v3 = vpop.xlane.xlu1 %174  ;;  %v182_v4 = vshra.s32 %v180_v2, 16  ;;  %v181_v10 = vand.u32 65535, %v180_v2 }
 0x468   :  { %vm177_vm9 = vcmp.eq.f32.partialorder %v169_v62, %v175_v3 }
 0x469   :  { %v179_v5 = vsel %vm177_vm9, %v316_v31, 4  ;;  %v184_v6 = vcvt.s32.f32 %v182_v4  ;;  %v183_v12 = vcvt.s32.f32 %v181_v10 }
 0x46a   :  { %v195_v7 = vsel %vm99_vm1, %v179_v5, 2147483647 }
 0x46b   :  { %185 = vmin.xlane.f32.xlu0 %v184_v6  ;;  %v197_v8 = vshra.s32 %v195_v7, 16  ;;  %v196_v13 = vand.u32 65535, %v195_v7 }
 0x46d   :  { %v199_v9 = vcvt.s32.f32 %v197_v8  ;;  %v198_v16 = vcvt.s32.f32 %v196_v13 }
 0x46f   :  { %200 = vmin.xlane.f32.xlu1 %v199_v9 }
 0x4f8   :  { %v186_v11 = vpop.xlane.xlu0 %185 }
 0x4f9   :  { %vm187_vm10 = vcmp.eq.f32.partialorder %v184_v6, %v186_v11  ;;  %v192_v18 = vcvt.f32.s32 %v186_v11 }
 0x4fa   :  { %v188_v14 = vsel %vm187_vm10, %v183_v12, inf }
 0x4fb   :  { %189 = vmin.xlane.f32.xlu0 %v188_v14  ;;  %v193_v20 = vshll.u32 %v192_v18, 16 }
 0x4fc   :  { %v201_v15 = vpop.xlane.xlu1 %200 }
 0x4fd   :  { %vm202_vm11 = vcmp.eq.f32.partialorder %v199_v9, %v201_v15  ;;  %v207_v21 = vcvt.f32.s32 %v201_v15 }
 0x4fe   :  { %v203_v17 = vsel %vm202_vm11, %v198_v16, inf }
 0x4ff   :  { %204 = vmin.xlane.f32.xlu1 %v203_v17  ;;  %v208_v27 = vshll.u32 %v207_v21, 16 }
 0x588   :  { %v190_v19 = vpop.xlane.xlu0 %189 }
 0x589   :  { %v191_v22 = vcvt.f32.s32 %v190_v19 }
 0x58b   :  { %v194_v23 = vadd.s32 %v193_v20, %v191_v22 }
 0x58c   :  { %v205_v24 = vpop.xlane.xlu1 %204 }
 0x58d   :  { %v206_v29 = vcvt.f32.s32 %v205_v24  ;;  %vm210_vm12 = vcmp.eq.s32.totalorder %v316_v31, %v194_v23 }
 0x58e   :  { %v212_v30 = vsel %vm210_vm12, %v308_v25, %v166_v26 }
 0x58f   :  { %v209_v32 = vadd.s32 %v208_v27, %v206_v29  ;;  %v214_v33 = vsel %vm99_vm1, %v212_v30, 0.0 }
 0x590   :  { %215 = vadd.xlane.f32.xlu0 %v214_v33 }
 0x591   :  { %vm211_vm13 = vcmp.eq.s32.totalorder %v316_v31, %v209_v32 }
 0x592   :  { %v213_v35 = vsel %vm211_vm13, %v312_v28, %v167_v34 }
 0x593   :  { %v217_v36 = vsel %vm99_vm1, %v213_v35, 0.0 }
 0x594   :  { %218 = vadd.xlane.f32.xlu1 %v217_v36 }
 0x61d   :  { %v216_v37 = vpop.xlane.xlu0 %215 }
 0x61e   :  { %v220_v38 = vadd.f32 1e-20, %v216_v37 }
 0x620   :  { %267 = vrcp.f32 %v220_v38 }
 0x621   :  { %v219_v39 = vpop.xlane.xlu1 %218 }
 0x622   :  { %v221_v25 = vadd.f32 1e-20, %v219_v39 }
 0x624   :  { %269 = vrcp.f32 %v221_v25 }
 0x62a   :  { %v268_v40 = vpop.eup %267 }
 0x62b   :  { %v223_v41 = vmul.f32 %v268_v40, %v212_v30 }
 0x62d   :  { %226 = vst.msk [vmem:[%s360_s2] sm:$0xff] %vm99_vm1, %v223_v41 }
 0x62e   :  { %v270_v42 = vpop.eup %269 }
 0x62f   :  { %v225_v31 = vmul.f32 %v270_v42, %v213_v35 }
 0x631   :  { %227 = vst.msk [vmem:[%s360_s2 + $0x8] sm:$0xff] %vm99_vm1, %v225_v31 }

</bundles_post_ra>
